<compile_context>
chip_gen: v7x
topology: tpu7x:2x2x1
jax: 0.10.0
libtpu: 0.0.40
codegen_flags: <defaults>
</compile_context>

<pallas_src>
import jax
import jax.numpy as jnp
from jax import lax
from jax.experimental import pallas as pl
from jax.experimental.pallas import tpu as pltpu


def _round_up(n, m):
    return ((n + m - 1) // m) * m


def _cdiv(a, b):
    return -(-a // b)


def _supports_pipeline_mode():
    """True if this Pallas version accepts BlockSpec(..., pipeline_mode=...)."""
    try:
        pl.BlockSpec((8, 128), lambda i: (0, 0), pipeline_mode=pl.Buffered(1))
        return True
    except Exception:
        return False


def _vmem_caps():
    """(budget_for_tiling, vmem_limit_bytes) derived from the chip's VMEM."""
    cap = 64 << 20  # conservative fallback (v7x per-TensorCore VMEM)
    try:
        cap = int(pltpu.get_tpu_info().vmem_capacity_bytes)
    except Exception:
        pass
    budget = max(int(cap * 0.75), 32 << 20)   # ~96 MiB on 128 MiB chips, ~48 MiB on v7x
    limit = max(int(cap * 0.80), 32 << 20)
    return budget, limit


def _auto_config(Bp, D, isx, isw, budget, pm_ok):
    """Pick (tb, tn) from the VMEM budget.

    isx/isw: itemsizes of the activation / weight compute dtype.
    Weight bytes are accounted once (single-buffered when resident), then the
    row tile tb is sized from the remainder (cap 1024 rows).
    """
    wbuf_resident = 1 if pm_ok else 2
    w_resident_bytes = wbuf_resident * (2 * D) * D * isw
    if w_resident_bytes <= budget // 2 or D % 128 != 0:
        # Keep the full stacked weight matrix resident in VMEM.
        tn = D
        w_bytes = w_resident_bytes
    else:
        # Stream (2D, tn) column slabs of the weights (double-buffered).
        tn = 128
        while tn * 2 < D and 2 * (2 * D) * (tn * 2) * isw <= budget // 2:
            tn *= 2
        w_bytes = 2 * (2 * D) * tn * isw
    rem = max(budget - w_bytes, 1 << 20)
    # Per-row bytes: double-buffered [z|x] tile (width 2D) + double-buffered y tile.
    per_row = 2 * (2 * D) * isx + 2 * tn * 4
    tb_limit = min(1024, max(8, Bp))
    if tb_limit * per_row <= rem:
        tb = tb_limit
    else:
        tb = 1024
        while tb > 8 and tb * per_row > rem:
            tb //= 2
    return max(8, tb), tn


def pde_loss_xz(x, y, z_hat, M, K, lmbda, *, reduction="mean",
                tb=None, tn=None, use_bf16=False):
    """Pallas implementation of PdeLoss_xz.forward.

    x, y, z_hat : [B, D]
    M, K        : [D, D] system matrices
    returns lmbda * reduce((z_hat @ M^T + x @ K^T - y) ** 2)
    """
    if reduction not in ("mean", "sum"):
        raise NotImplementedError(f"reduction={reduction!r}")
    B, D = x.shape

    cdt = jnp.bfloat16 if use_bf16 else jnp.float32
    itemsize = jnp.dtype(cdt).itemsize

    budget, vmem_limit = _vmem_caps()
    pm_ok = _supports_pipeline_mode()

    # Pad the batch only up to a multiple of 8 (<= 7 zero rows); zero rows give
    # a zero residual so they never perturb the sum.
    Bp = max(8, _round_up(B, 8))

    auto_tb, auto_tn = _auto_config(Bp, D, itemsize, itemsize, budget, pm_ok)
    if tb is None:
        tb = auto_tb
    tb = max(8, _round_up(min(tb, min(1024, Bp)), 8))
    if tn is None:
        tn = auto_tn
    elif D % 128 != 0 or tn >= D:
        tn = D
    else:
        tn = min(_round_up(max(tn, 128), 128), D)
    resident = (tn == D)

    nb = _cdiv(Bp, tb)
    nt = _cdiv(D, tn)
    needs_mask = (Bp % tb) != 0   # ragged tail tile -> mask rows >= true B

    # Fused operands: [z_hat | x]  and  [M^T ; K^T] so the kernel does a single
    # (tb, 2D) x (2D, tn) MXU pass instead of two matmuls + a VPU add.
    xz = jnp.concatenate([jnp.asarray(z_hat, cdt), jnp.asarray(x, cdt)], axis=1)
    W = jnp.concatenate([jnp.asarray(M, cdt).T, jnp.asarray(K, cdt).T], axis=0)
    y32 = jnp.asarray(y, jnp.float32)
    if Bp != B:
        xz = jnp.pad(xz, ((0, Bp - B), (0, 0)))
        y32 = jnp.pad(y32, ((0, Bp - B), (0, 0)))

    def kernel(xz_ref, y_ref, w_ref, part_ref):
        # residual tile: (tb, tn)
        r = jnp.dot(xz_ref[...], w_ref[...],
                    preferred_element_type=jnp.float32) - y_ref[...]
        r2 = r * r
        if needs_mask:
            rows = pl.program_id(0) * tb + lax.broadcasted_iota(
                jnp.int32, r2.shape, 0)
            r2 = jnp.where(rows < B, r2, 0.0)
        # Partial sum over the sublane (batch) axis only; the tiny cross-lane
        # reduction happens once, outside the kernel.
        part_ref[...] = jnp.sum(r2, axis=0).reshape(1, 1, -1)

    w_spec_kwargs = {}
    if resident and pm_ok:
        # Constant index_map -> double-buffering buys nothing; halve the VMEM.
        w_spec_kwargs["pipeline_mode"] = pl.Buffered(1)
    w_spec = pl.BlockSpec((2 * D, tn), lambda i, n: (0, n), **w_spec_kwargs)

    partials = pl.pallas_call(
        kernel,
        out_shape=jax.ShapeDtypeStruct((nb, 1, D), jnp.float32),
        grid_spec=pltpu.PrefetchScalarGridSpec(
            num_scalar_prefetch=0,
            grid=(nb, nt),
            in_specs=[
                pl.BlockSpec((tb, 2 * D), lambda i, n: (i, 0)),  # [z|x] row tile
                pl.BlockSpec((tb, tn), lambda i, n: (i, n)),     # y tile
                w_spec,                                          # stacked weights
            ],
            out_specs=pl.BlockSpec((1, 1, tn), lambda i, n: (i, 0, n)),
        ),
        compiler_params=pltpu.CompilerParams(
            dimension_semantics=("parallel", "parallel"),  # independent tiles
            vmem_limit_bytes=int(vmem_limit),
        ),
    )(xz, y32, W)

    total = jnp.sum(partials, dtype=jnp.float32)
    if reduction == "mean":
        total = total / jnp.float32(B * D)
    return jnp.float32(lmbda) * total


def pde_loss_xz_ref(x, y, z_hat, M, K, lmbda, reduction="mean"):
    r = z_hat @ M.T + x @ K.T - y
    red = jnp.mean if reduction == "mean" else jnp.sum
    return jnp.float32(lmbda) * red(r * r)


if __name__ == "__main__":
    key = jax.random.PRNGKey(0)
    kx, ky, kz, km, kk = jax.random.split(key, 5)

    B, D = 20, 128          # B not a multiple of 8 -> exercises the pad/mask path
    lmbda = 0.5

    x = jax.random.normal(kx, (B, D), dtype=jnp.float32)
    y = jax.random.normal(ky, (B, D), dtype=jnp.float32)
    z_hat = jax.random.normal(kz, (B, D), dtype=jnp.float32)
    # Deterministic "system" matrices (mass / stiffness analogues).
    M = jax.random.normal(km, (D, D), dtype=jnp.float32) * 0.1
    K = jax.random.normal(kk, (D, D), dtype=jnp.float32) * 0.1

    ref = jax.block_until_ready(pde_loss_xz_ref(x, y, z_hat, M, K, lmbda))

    # Auto config: single row tile, resident fused weights.
    loss = jax.block_until_ready(pde_loss_xz(x, y, z_hat, M, K, lmbda))
    assert jnp.allclose(loss, ref, rtol=1e-5, atol=1e-5), (loss, ref)

    # Forced small row tile: multi-step grid.
    loss8 = jax.block_until_ready(pde_loss_xz(x, y, z_hat, M, K, lmbda, tb=8))
    assert jnp.allclose(loss8, ref, rtol=1e-5, atol=1e-5), (loss8, ref)

    # Forced tb that does not divide the (8-padded) batch: masked ragged tail tile.
    loss16 = jax.block_until_ready(pde_loss_xz(x, y, z_hat, M, K, lmbda, tb=16))
    assert jnp.allclose(loss16, ref, rtol=1e-5, atol=1e-5), (loss16, ref)

    # Forced column tiling (streamed weight slabs) at a slightly larger D.
    B2, D2 = 24, 256
    x2 = jax.random.normal(kx, (B2, D2), dtype=jnp.float32)
    y2 = jax.random.normal(ky, (B2, D2), dtype=jnp.float32)
    z2 = jax.random.normal(kz, (B2, D2), dtype=jnp.float32)
    M2 = jax.random.normal(km, (D2, D2), dtype=jnp.float32) * 0.1
    K2 = jax.random.normal(kk, (D2, D2), dtype=jnp.float32) * 0.1
    ref2 = jax.block_until_ready(pde_loss_xz_ref(x2, y2, z2, M2, K2, lmbda))
    loss2 = jax.block_until_ready(
        pde_loss_xz(x2, y2, z2, M2, K2, lmbda, tb=8, tn=128))
    assert jnp.allclose(loss2, ref2, rtol=1e-5, atol=1e-5), (loss2, ref2)

    # Optional bf16 MXU path (f32 accumulation) -- looser tolerance vs f32 ref.
    loss_bf16 = jax.block_until_ready(
        pde_loss_xz(x, y, z_hat, M, K, lmbda, use_bf16=True))
    assert jnp.allclose(loss_bf16, ref, rtol=5e-2, atol=5e-2), (loss_bf16, ref)

    print("KERNEL_OK")
</pallas_src>

<mosaic_0001>
module attributes {stable_mosaic.version = 11 : i64} {
  func.func @kernel(%arg0: i32, %arg1: i32, %arg2: memref<24x256xf32, #tpu.memory_space<vmem>>, %arg3: memref<24x128xf32, #tpu.memory_space<vmem>>, %arg4: memref<256x128xf32, #tpu.memory_space<vmem>>, %arg5: memref<1x1x128xf32, #tpu.memory_space<vmem>>) attributes {dimension_semantics = [#tpu.dimension_semantics<parallel>, #tpu.dimension_semantics<parallel>], iteration_bounds = array<i64: 1, 1>, scalar_prefetch = 0 : i64, scratch_operands = 0 : i64, tpu.core_type = #tpu.core_type<tc>, window_params = [{transform_indices = @transform_0, window_bounds = array<i64: 24, 256>}, {transform_indices = @transform_1, window_bounds = array<i64: 24, 128>}, {pipeline_mode = #tpu.pipeline_mode<synchronous>, transform_indices = @transform_2, window_bounds = array<i64: 256, 128>}, {transform_indices = @transform_3, window_bounds = array<i64: 1, 1, 128>}]} {
    %c0 = arith.constant 0 : index
    %c0_0 = arith.constant 0 : index
    %0 = vector.load %arg2[%c0, %c0_0] : memref<24x256xf32, #tpu.memory_space<vmem>>, vector<24x256xf32>
    %c0_1 = arith.constant 0 : index
    %c0_2 = arith.constant 0 : index
    %1 = vector.load %arg4[%c0_1, %c0_2] : memref<256x128xf32, #tpu.memory_space<vmem>>, vector<256x128xf32>
    %cst = arith.constant dense<0.000000e+00> : vector<24x128xf32>
    %2 = tpu.matmul %0, %1, %cst {dimension_numbers = #tpu.dot_dimension_numbers<[1], [0], [0], [1], [0, 0, 1, 1], [], []>} : vector<24x256xf32>, vector<256x128xf32>, vector<24x128xf32> -> vector<24x128xf32>
    %c0_3 = arith.constant 0 : index
    %c0_4 = arith.constant 0 : index
    %3 = vector.load %arg3[%c0_3, %c0_4] : memref<24x128xf32, #tpu.memory_space<vmem>>, vector<24x128xf32>
    %4 = arith.subf %2, %3 : vector<24x128xf32>
    %5 = arith.mulf %4, %4 : vector<24x128xf32>
    %cst_5 = arith.constant dense<0.000000e+00> : vector<128xf32>
    %6 = vector.multi_reduction <add>, %5, %cst_5 [0] : vector<24x128xf32> to vector<128xf32>
    %7 = vector.shape_cast %6 : vector<128xf32> to vector<1x1x128xf32>
    %c0_6 = arith.constant 0 : index
    %c0_7 = arith.constant 0 : index
    %c0_8 = arith.constant 0 : index
    %8 = vector.load %arg5[%c0_6, %c0_7, %c0_8] : memref<1x1x128xf32, #tpu.memory_space<vmem>>, vector<1x1x128xf32>
    tpu.vector_store %arg5[%c0_6, %c0_7, %c0_8], %7 {strides = array<i32>} : memref<1x1x128xf32, #tpu.memory_space<vmem>>, vector<1x1x128xf32>,
    return
  }
  func.func @transform_0(%arg0: i32, %arg1: i32) -> (i32, i32) {
    %c0_i32 = arith.constant 0 : i32
    %c0_i32_0 = arith.constant 0 : i32
    return %arg0, %c0_i32 : i32, i32
  }
  func.func @transform_1(%arg0: i32, %arg1: i32) -> (i32, i32) {
    %c0_i32 = arith.constant 0 : i32
    return %arg0, %arg1 : i32, i32
  }
  func.func @transform_2(%arg0: i32, %arg1: i32) -> (i32, i32) {
    %c0_i32 = arith.constant 0 : i32
    %c0_i32_0 = arith.constant 0 : i32
    return %c0_i32, %arg1 : i32, i32
  }
  func.func @transform_3(%arg0: i32, %arg1: i32) -> (i32, i32, i32) {
    %c0_i32 = arith.constant 0 : i32
    %c0_i32_0 = arith.constant 0 : i32
    return %arg0, %c0_i32, %arg1 : i32, i32, i32
  }
}

</mosaic_0001>

<bundles_post_ra>
// kernel: tpu_custom_call.1
= control target key start
LH: loop header
LB: loop body
LE: loop exit
PB: predicated region body
PF: predicated region fallthrough
CT: control target
= control target key end

     0   :  { %8 = vsyncpa [#allocation3], 0  ;;  %s481_s0 = inlined_call_operand.hbm [shape: f32[24,256], index: 0, kind: input, shape index: {}]   ;;  %s482_s1 = inlined_call_operand.hbm [shape: f32[24,128], index: 1, kind: input, shape index: {}]   ;;  %s483_s2 = inlined_call_operand.hbm [shape: f32[256,128], index: 2, kind: input, shape index: {}]   ;;  %s484_s3 = inlined_call_operand.hbm [shape: f32[1,1,128], index: 3, kind: output, shape index: {}]  }
   0x1   :  { %9 = vsyncpa [#allocation6], 0 }
   0x2   :  { %10 = vsyncpa [#allocation4], 0  ;;  %s399_s12 = smov [#allocation5]   ;;  %s305_s16 = scalar_lea.hbm %s482_s1, 384 }
   0x3   :  { %s28_s13 = sshll.u32 %s399_s12, 4  ;;  %p306_p0 = scmp.ne.s32.totalorder %s482_s1, %s305_s16  ;;  %s29_s13 = int_to_ptr.vmem [resolvable:$true] %s28_s13 }
   0x4   :  { %p309_p1 = scmp.lt.u32.totalorder %s305_s16, %s482_s1 }
   0x6   :  { %p311_p2 = pnand %p309_p1, %p306_p0 }
   0x8   :  { %314 = shalt.err (!%p311_p2)
}
   0x9   :  { %s315_s21 = scalar_lea.vmem %s29_s13, 384  ;;  %p320_p4 = scmp.lt.s32.totalorder %s29_s13, %s29_s13 }
   0xa   :  { %p316_p3 = scmp.ne.s32.totalorder %s29_s13, %s315_s21  ;;  %p321_p5 = scmp.lt.s32.totalorder %s315_s21, %s315_s21 }
   0xc   :  { %p322_p6 = por %p321_p5, %p320_p4 }
   0xe   :  { %p323_p7 = pnand %p322_p6, %p316_p3 }
  0x10   :  { %326 = shalt.err (!%p323_p7)
}
  0x11   :  { %s400_s22 = smov 128   ;;  %s401_s23 = smov 8  }
  0x12   :  { %34 = dma.hbm_to_vmem [thread:$0]  %s482_s1, 384, %s29_s13, [#allocation6], %s400_s22, %s400_s22, %s401_s23  }
  0x13   :  { %s402_s26 = smov [#allocation2]   ;;  %s327_s30 = scalar_lea.hbm %s481_s0, 768 }
  0x14   :  { %s16_s27 = sshll.u32 %s402_s26, 4  ;;  %p328_p8 = scmp.ne.s32.totalorder %s481_s0, %s327_s30  ;;  %s17_s27 = int_to_ptr.vmem [resolvable:$true] %s16_s27 }
  0x15   :  { %p331_p9 = scmp.lt.u32.totalorder %s327_s30, %s481_s0 }
  0x17   :  { %p333_p10 = pnand %p331_p9, %p328_p8 }
  0x19   :  { %336 = shalt.err (!%p333_p10)
}
  0x1a   :  { %s337_s8 = scalar_lea.vmem %s17_s27, 768  ;;  %p342_p12 = scmp.lt.s32.totalorder %s17_s27, %s17_s27 }
  0x1b   :  { %p338_p11 = scmp.ne.s32.totalorder %s17_s27, %s337_s8  ;;  %p343_p13 = scmp.lt.s32.totalorder %s337_s8, %s337_s8 }
  0x1d   :  { %p344_p0 = por %p343_p13, %p342_p12 }
  0x1f   :  { %p345_p1 = pnand %p344_p0, %p338_p11 }
  0x21   :  { %348 = shalt.err (!%p345_p1)
}
  0x22   :  { %s403_s1 = smov 256   ;;  %s404_s9 = smov 16  }
  0x23   :  { %22 = dma.hbm_to_vmem [thread:$0]  %s481_s0, 768, %s17_s27, [#allocation3], %s403_s1, %s403_s1, %s404_s9  }
  0x24   :  { %s405_s12 = smov [#allocation7]   ;;  %s349_s16 = scalar_lea.hbm %s483_s2, 4096 }
  0x25   :  { %s40_s13 = sshll.u32 %s405_s12, 4  ;;  %p350_p2 = scmp.ne.s32.totalorder %s483_s2, %s349_s16  ;;  %s41_s13 = int_to_ptr.vmem [resolvable:$true] %s40_s13 }
  0x26   :  { %p353_p3 = scmp.lt.u32.totalorder %s349_s16, %s483_s2 }
  0x28   :  { %p355_p4 = pnand %p353_p3, %p350_p2 }
  0x2a   :  { %358 = shalt.err (!%p355_p4)
}
  0x2b   :  { %s359_s21 = scalar_lea.vmem %s41_s13, 4096  ;;  %p364_p6 = scmp.lt.s32.totalorder %s41_s13, %s41_s13 }
  0x2c   :  { %p360_p5 = scmp.ne.s32.totalorder %s41_s13, %s359_s21  ;;  %p365_p7 = scmp.lt.s32.totalorder %s359_s21, %s359_s21 }
  0x2e   :  { %p366_p8 = por %p365_p7, %p364_p6 }
  0x30   :  { %p367_p9 = pnand %p366_p8, %p360_p5 }
  0x32   :  { %370 = shalt.err (!%p367_p9)
}
  0x33   :  { %46 = dma.hbm_to_vmem [thread:$0]  %s483_s2, 4096, %s41_s13, [#allocation6], %s400_s22, %s400_s22, %s401_s23  }
  0x34   :  { %393 = dma.done.wait [#allocation3], 768  }
  0x35   :  { %394 = vsyncadd [#allocation3], 4294966528 }
  0x36   :  { %395 = dma.done.wait [#allocation6], 4480  }
  0x37   :  { %396 = vsyncadd [#allocation6], 4294962816  ;;  %v78_v0 = vld [vmem:[#allocation7 + $0x80] sm:$0xff]  ;;  %v79_v1 = vld [vmem:[#allocation7 + $0x88] sm:$0xff]  ;;  %s406_s2 = smov [#allocation8]  }
  0x38   :  { %v62_v2 = vld [vmem:[#allocation7] sm:$0xff]  ;;  %v249_v3 = vpack.c.bf16 %v79_v1, %v78_v0  ;;  %v63_v4 = vld [vmem:[#allocation7 + $0x8] sm:$0xff]  ;;  %v80_v5 = vld [vmem:[#allocation7 + $0x90] sm:$0xff]  ;;  %s198_s22 = sshll.u32 %s406_s2, 4  ;;  %s199_s22 = int_to_ptr.vmem [resolvable:$true] %s198_s22 }
  0x39   :  { %v81_v6 = vld [vmem:[#allocation7 + $0x98] sm:$0xff]  ;;  %v251_v7 = vpack.c.bf16 %v63_v4, %v62_v2  ;;  %v64_v9 = vld [vmem:[#allocation7 + $0x10] sm:$0xff]  ;;  %v82_v11 = vld [vmem:[#allocation7 + $0xa0] sm:$0xff]  ;;  %s371_s23 = scalar_lea.vmem %s199_s22, 16  ;;  %s375_s25 = scalar_lea.vmem %s199_s22, 32 }
  0x3a   :  { %v253_v8 = vpack.c.bf16 %v81_v6, %v80_v5  ;;  %v65_v10 = vld [vmem:[#allocation7 + $0x18] sm:$0xff]  ;;  %250 = vmatprep.subr.bf16.mxu0 %v249_v3  ;;  %281 = vmatprep.subr.bf16.mxu1 %v249_v3  ;;  %v83_v12 = vld [vmem:[#allocation7 + $0xa8] sm:$0xff]  ;;  %v66_v15 = vld [vmem:[#allocation7 + $0x20] sm:$0xff]  ;;  %p372_p10 = scmp.ne.s32.totalorder %s199_s22, %s371_s23  ;;  %p376_p11 = scmp.lt.s32.totalorder %s199_s22, %s199_s22 }
  0x3b   :  { %252 = vmatpush3.bf16.msra.mxu0 %v251_v7  ;;  %289 = vmatpush3.bf16.msra.mxu1 %v251_v7  ;;  %v255_v13 = vpack.c.bf16 %v65_v10, %v64_v9  ;;  %v257_v14 = vpack.c.bf16 %v83_v12, %v82_v11  ;;  %v67_v16 = vld [vmem:[#allocation7 + $0x28] sm:$0xff]  ;;  %v84_v17 = vld [vmem:[#allocation7 + $0xb0] sm:$0xff]  ;;  %v85_v18 = vld [vmem:[#allocation7 + $0xb8] sm:$0xff]  ;;  %p377_p12 = scmp.lt.s32.totalorder %s375_s25, %s371_s23 }
  0x3c   :  { %254 = vmatprep.subr.bf16.mxu0 %v253_v8  ;;  %282 = vmatprep.subr.bf16.mxu1 %v253_v8  ;;  %v259_v19 = vpack.c.bf16 %v67_v16, %v66_v15  ;;  %v261_v20 = vpack.c.bf16 %v85_v18, %v84_v17  ;;  %v68_v21 = vld [vmem:[#allocation7 + $0x30] sm:$0xff]  ;;  %v69_v22 = vld [vmem:[#allocation7 + $0x38] sm:$0xff]  ;;  %v86_v23 = vld [vmem:[#allocation7 + $0xc0] sm:$0xff] }
  0x3d   :  { %v87_v24 = vld [vmem:[#allocation7 + $0xc8] sm:$0xff]  ;;  %v57_v25 = vld [vmem:[#allocation2 + $0x8] sm:$0xff]  ;;  %v59_v26 = vld [vmem:[#allocation2 + $0x18] sm:$0xff]  ;;  %v263_v27 = vpack.c.bf16 %v69_v22, %v68_v21  ;;  %p378_p13 = por %p377_p12, %p376_p11 }
  0x3e   :  { %158 = vmatprep.mubr.f32.mxu0 %v57_v25  ;;  %v265_v28 = vpack.c.bf16 %v87_v24, %v86_v23  ;;  %v70_v29 = vld [vmem:[#allocation7 + $0x40] sm:$0xff]  ;;  %v71_v30 = vld [vmem:[#allocation7 + $0x48] sm:$0xff]  ;;  %v88_v31 = vld [vmem:[#allocation7 + $0xd0] sm:$0xff]  ;;  %163 = vmatprep.mubr.f32.mxu1 %v59_v26 }
  0x3f   :  { %256 = vmatpush3.bf16.msra.mxu0 %v255_v13  ;;  %290 = vmatpush3.bf16.msra.mxu1 %v255_v13  ;;  %v89_v32 = vld [vmem:[#allocation7 + $0xd8] sm:$0xff]  ;;  %v267_v33 = vpack.c.bf16 %v71_v30, %v70_v29  ;;  %v72_v35 = vld [vmem:[#allocation7 + $0x50] sm:$0xff]  ;;  %v90_v37 = vld [vmem:[#allocation7 + $0xe0] sm:$0xff]  ;;  %p379_p0 = pnand %p378_p13, %p372_p10 }
  0x40   :  { %258 = vmatprep.subr.bf16.mxu0 %v257_v14  ;;  %283 = vmatprep.subr.bf16.mxu1 %v257_v14  ;;  %v269_v34 = vpack.c.bf16 %v89_v32, %v88_v31  ;;  %v73_v36 = vld [vmem:[#allocation7 + $0x58] sm:$0xff]  ;;  %v91_v38 = vld [vmem:[#allocation7 + $0xe8] sm:$0xff]  ;;  %v74_v41 = vld [vmem:[#allocation7 + $0x60] sm:$0xff] }
  0x41   :  { %v271_v39 = vpack.c.bf16 %v73_v36, %v72_v35  ;;  %v273_v40 = vpack.c.bf16 %v91_v38, %v90_v37  ;;  %v75_v42 = vld [vmem:[#allocation7 + $0x68] sm:$0xff]  ;;  %v92_v43 = vld [vmem:[#allocation7 + $0xf0] sm:$0xff]  ;;  %v93_v44 = vld [vmem:[#allocation7 + $0xf8] sm:$0xff] }
  0x42   :  { %v275_v45 = vpack.c.bf16 %v75_v42, %v74_v41  ;;  %v277_v46 = vpack.c.bf16 %v93_v44, %v92_v43  ;;  %v76_v47 = vld [vmem:[#allocation7 + $0x70] sm:$0xff]  ;;  %v77_v48 = vld [vmem:[#allocation7 + $0x78] sm:$0xff]  ;;  %v58_v51 = vld [vmem:[#allocation2 + $0x10] sm:$0xff] }
  0x43   :  { %260 = vmatpush3.bf16.msra.mxu0 %v259_v19  ;;  %291 = vmatpush3.bf16.msra.mxu1 %v259_v19  ;;  %v279_v49 = vpack.c.bf16 %v77_v48, %v76_v47  ;;  %v56_v50 = vld [vmem:[#allocation2] sm:$0xff]  ;;  %v61_v52 = vld [vmem:[#allocation2 + $0x28] sm:$0xff]  ;;  %v174_v57 = vld [vmem:[#allocation5] sm:$0xff] }
  0x44   :  { %262 = vmatprep.subr.bf16.mxu0 %v261_v20  ;;  %284 = vmatprep.subr.bf16.mxu1 %v261_v20  ;;  %v60_v53 = vld [vmem:[#allocation2 + $0x20] sm:$0xff]  ;;  %v175_v59 = vld [vmem:[#allocation5 + $0x8] sm:$0xff] }
  0x45   :  { %v176_v2 = vld [vmem:[#allocation5 + $0x10] sm:$0xff] }
  0x47   :  { %264 = vmatpush3.bf16.msra.mxu0 %v263_v27  ;;  %292 = vmatpush3.bf16.msra.mxu1 %v263_v27 }
  0x48   :  { %266 = vmatprep.subr.bf16.mxu0 %v265_v28  ;;  %285 = vmatprep.subr.bf16.mxu1 %v265_v28 }
  0x4b   :  { %268 = vmatpush3.bf16.msra.mxu0 %v267_v33  ;;  %293 = vmatpush3.bf16.msra.mxu1 %v267_v33 }
  0x4c   :  { %270 = vmatprep.subr.bf16.mxu0 %v269_v34  ;;  %286 = vmatprep.subr.bf16.mxu1 %v269_v34 }
  0x4f   :  { %272 = vmatpush3.bf16.msra.mxu0 %v271_v39  ;;  %294 = vmatpush3.bf16.msra.mxu1 %v271_v39 }
  0x50   :  { %274 = vmatprep.subr.bf16.mxu0 %v273_v40  ;;  %287 = vmatprep.subr.bf16.mxu1 %v273_v40 }
  0x53   :  { %276 = vmatpush3.bf16.msra.mxu0 %v275_v45  ;;  %295 = vmatpush3.bf16.msra.mxu1 %v275_v45 }
  0x54   :  { %278 = vmatprep.subr.bf16.mxu0 %v277_v46  ;;  %288 = vmatprep.subr.bf16.mxu1 %v277_v46 }
  0x57   :  { %280 = vmatpush3.bf16.msra.mxu0 %v279_v49  ;;  %296 = vmatpush3.bf16.msra.mxu1 %v279_v49 }
  0x5a   :  { %159 = vmatmul.mubr.f32.vlgmr.msra.gmra.mrb[0].mxu0 %v56_v50  ;;  %164 = vmatmul.mubr.f32.vlgmr.msra.gmra.mrb[0].mxu1 %v58_v51 }
  0x5b   :  { %168 = vmatprep.mubr.f32.mxu1 %v61_v52 }
  0x5e   :  { %169 = vmatmul.mubr.f32.gmra.mrb[2].mxu1 %v60_v53 }
 0x12d   :  { %v240_v54 = vpop.f32.mrb[0].mxu0  ;;  %v243_v55 = vpop.f32.mrb[0].mxu1 }
 0x12e   :  { %v241_v56 = vpop.f32.mrb[1].mxu0  ;;  %v244_v58 = vpop.f32.mrb[1].mxu1 }
 0x12f   :  { %v242_v60 = vadd.f32 %v241_v56, %v240_v54  ;;  %v245_v61 = vadd.f32 %v244_v58, %v243_v55 }
 0x131   :  { %v177_v62 = vsub.f32 %v242_v60, %v174_v57  ;;  %v178_v63 = vsub.f32 %v245_v61, %v175_v59  ;;  %v246_v0 = vpop.f32.mrb[2].mxu1 }
 0x132   :  { %v247_v1 = vpop.f32.mrb[3].mxu1 }
 0x133   :  { %v180_v3 = vmul.f32 %v177_v62, %v177_v62  ;;  %v181_v4 = vmul.f32 %v178_v63, %v178_v63  ;;  %v248_v5 = vadd.f32 %v247_v1, %v246_v0 }
 0x135   :  { %v183_v6 = vadd.f32 %v181_v4, %v180_v3  ;;  %v179_v7 = vsub.f32 %v248_v5, %v176_v2 }
 0x137   :  { %v182_v8 = vmul.f32 %v179_v7, %v179_v7 }
 0x139   :  { %v184_v9 = vadd.f32 %v183_v6, %v182_v8 }
 0x13b   :  { %v185_v10 = vrot.slane %v184_v9, 4 }
 0x13d   :  { %v186_v11 = vadd.f32 %v185_v10, %v184_v9 }
 0x13f   :  { %v187_v12 = vrot.slane %v186_v11, 2 }
 0x141   :  { %v188_v13 = vadd.f32 %v187_v12, %v186_v11 }
 0x143   :  { %v189_v14 = vrot.slane %v188_v13, 1 }
 0x145   :  { %v190_v15 = vadd.f32 %v189_v14, %v188_v13 }
 0x147   :  { %191 = vst [vmem:[#allocation8] sm:$0x1] %v190_v15 }
 0x148   :  { %382 = shalt.err (!%p379_p0)
}
 0x149   :  { %s383_s28 = scalar_lea.hbm %s484_s3, 16 }
 0x14a   :  { %p384_p1 = scmp.ne.s32.totalorder %s484_s3, %s383_s28  ;;  %p387_p2 = scmp.lt.u32.totalorder %s383_s28, %s484_s3 }
 0x14c   :  { %p389_p3 = pnand %p387_p2, %p384_p1 }
 0x14e   :  { %392 = shalt.err (!%p389_p3)
}
 0x14f   :  { %201 = dma.vmem_to_hbm [thread:$0]  %s199_s22, 16, %s484_s3, [#allocation4]  }
 0x150   :  { %397 = dma.done.wait [#allocation4], 16  }
 0x151   :  { %398 = vsyncadd [#allocation4], 4294967280 }
 0x152   :  { %205 = vsyncpa [#allocation3], 1 }
 0x153   :  { %206 = vsyncpa [#allocation6], 1 }
 0x154   :  { %207 = vsyncpa [#allocation4], 1 }

</bundles_post_ra>
